<compile_context>
chip_gen: v7x
topology: tpu7x:2x2x1
jax: 0.10.0
libtpu: 0.0.40
codegen_flags: <defaults>
</compile_context>

<pallas_src>
import functools

import jax
import jax.numpy as jnp
from jax import lax
from jax.experimental import pallas as pl
from jax.experimental.pallas import tpu as pltpu


def _covpool_kernel(x_ref, y_ref, acc_ref, s_ref, *, inv_m, precision):
    """One (batch-tile, M-tile) step of y = (1/M) X X^T - (1/M^2) s s^T."""
    m_idx = pl.program_id(1)

    @pl.when(m_idx == 0)
    def _init():
        acc_ref[...] = jnp.zeros_like(acc_ref)
        s_ref[...] = jnp.zeros_like(s_ref)

    x = x_ref[...]  # storage dtype; no materialized f32 copy of the tile

    # Partial Gram over this M tile: MXU matmul contracting the last dims,
    # batched over the batch tile, accumulating in f32.
    acc_ref[...] += lax.dot_general(
        x, x,
        dimension_numbers=(((2,), (2,)), ((0,), (0,))),
        precision=precision,
        preferred_element_type=jnp.float32,
    )
    # Partial rowsum with f32 accumulation (VPU; co-issues with MXU work).
    s_ref[...] += jnp.sum(x, axis=-1, dtype=jnp.float32)

    @pl.when(m_idx == pl.num_programs(1) - 1)
    def _finalize():
        s = s_ref[...] * inv_m                        # tiny (tb, Cp) pre-scale
        y = inv_m * acc_ref[...] - s[:, :, None] * s[:, None, :]
        y_ref[...] = y.astype(y_ref.dtype)


def _round_up(v, m):
    return ((v + m - 1) // m) * m


def _tpu_budget_and_cores():
    """Return (total VMEM budget in bytes, chip has 2 TensorCores?)."""
    vmem_cap = 64 * 1024 * 1024                       # conservative (v7x) default
    try:
        vmem_cap = int(pltpu.get_tpu_info().vmem_capacity_bytes)
    except Exception:
        pass
    multi_tc = False
    try:
        kind = jax.devices()[0].device_kind.lower()
        multi_tc = "v7" in kind                       # v7x: 2 TCs per chip
    except Exception:
        pass
    # Leave headroom for Mosaic-internal scratch; cap at ~96 MiB on 128 MiB parts.
    budget = min((vmem_cap * 3) // 4, 96 * 1024 * 1024)
    return budget, multi_tc


def _select_tiles(B, Cp, Mp, itemsize, budget, multi_tc):
    """Pick (tb, tm): batch elements per grid step and M-tile width."""
    # Per-batch-element residency that does NOT shrink with the M tile:
    #   double-buffered output block + f32 Gram accumulator + ~2 f32 epilogue
    #   temporaries for the (Cp, Cp) expressions.
    fixed_per_b = Cp * Cp * (2 * itemsize + 4 + 2 * 4)
    # Per-M-tile bytes per batch element at the minimum (128-wide) tile:
    # double-buffered input + possible f32 reduce temporary.
    per_m_col = Cp * (2 * itemsize + 4)
    min_in_per_b = 128 * per_m_col

    feasible = [d for d in range(1, B + 1)
                if B % d == 0 and d * (fixed_per_b + min_in_per_b) <= budget]
    if not feasible:
        feasible = [1]
    if multi_tc and B >= 2:
        # Prefer an even number of batch grid steps (balanced across 2 TCs).
        even = [d for d in feasible if (B // d) % 2 == 0]
        tb = max(even) if even else max(feasible)
    else:
        # Single TensorCore: biggest blocks / fewest grid steps wins.
        tb = max(feasible)

    in_budget = max(budget - tb * fixed_per_b, tb * min_in_per_b)
    tm = 128
    for cand in range(128, Mp + 1, 128):
        if Mp % cand == 0 and tb * cand * per_m_col <= in_budget:
            tm = cand
    return tb, tm


def covpool(x, *, precision=None):
    """x: (B, C, H, W) -> (B, C, C); matches the PyTorch covpool forward."""
    B, C, H, W = x.shape
    M = H * W
    x_flat = x.reshape(B, C, M)

    # Pad to TPU-friendly shapes: sublane-multiple C, lane-dense M tiles.
    # Zero padding along M is exact (divisor stays the true M); padded channel
    # rows produce zero rows/cols that are cropped at the end.
    Cp = _round_up(max(C, 8), 8)
    Mp = _round_up(max(M, 128), 128)
    if (Cp, Mp) != (C, M):
        x_flat = jnp.pad(x_flat, ((0, 0), (0, Cp - C), (0, Mp - M)))

    itemsize = x_flat.dtype.itemsize
    budget, multi_tc = _tpu_budget_and_cores()
    tb, tm = _select_tiles(B, Cp, Mp, itemsize, budget, multi_tc)

    if precision is None:
        # Accuracy-safe default for f32 (matches the f32 PyTorch reference);
        # bf16 uses the native single-pass MXU path.
        precision = (lax.Precision.HIGHEST
                     if x_flat.dtype == jnp.float32 else lax.Precision.DEFAULT)

    kernel = functools.partial(_covpool_kernel, inv_m=1.0 / M,
                               precision=precision)

    grid_spec = pltpu.PrefetchScalarGridSpec(
        num_scalar_prefetch=0,
        grid=(B // tb, Mp // tm),                     # reduction axis (M) last
        in_specs=[pl.BlockSpec((tb, Cp, tm), lambda b, m: (b, 0, m))],
        out_specs=pl.BlockSpec((tb, Cp, Cp), lambda b, m: (b, 0, 0)),
        scratch_shapes=[
            pltpu.VMEM((tb, Cp, Cp), jnp.float32),    # Gram accumulator
            pltpu.VMEM((tb, Cp), jnp.float32),        # rowsum accumulator
        ],
    )

    y_pad = pl.pallas_call(
        kernel,
        out_shape=jax.ShapeDtypeStruct((B, Cp, Cp), x.dtype),
        grid_spec=grid_spec,
        compiler_params=pltpu.CompilerParams(
            dimension_semantics=("parallel", "arbitrary"),
            vmem_limit_bytes=int(budget),
        ),
    )(x_flat)

    # Crop the channel padding only when it was actually added.
    if Cp != C:
        y_pad = y_pad[:, :C, :C]
    return y_pad


if __name__ == "__main__":
    key = jax.random.PRNGKey(0)
    B, C, H, W = 2, 4, 16, 16
    x = jax.random.normal(key, (B, C, H, W), dtype=jnp.float32)

    y = covpool(x)
    jax.block_until_ready(y)

    # Pure-JAX reference of the exact PyTorch semantics.
    M = H * W
    xr = x.reshape(B, C, M)
    ihat = (-1.0 / (M * M)) * jnp.ones((M, M), jnp.float32) \
           + (1.0 / M) * jnp.eye(M, dtype=jnp.float32)
    y_ref = jnp.einsum("bcm,mn,bdn->bcd", xr, ihat, xr,
                       precision=lax.Precision.HIGHEST)
    assert y.shape == (B, C, C)
    assert jnp.allclose(y, y_ref, atol=1e-4, rtol=1e-4)

    # bf16 end-to-end path (native MXU dtype, f32 in-kernel accumulation).
    xb = x.astype(jnp.bfloat16)
    yb = covpool(xb)
    jax.block_until_ready(yb)
    assert yb.shape == (B, C, C) and yb.dtype == jnp.bfloat16
    assert jnp.allclose(yb.astype(jnp.float32), y_ref, atol=5e-2, rtol=5e-2)

    print("KERNEL_OK")
</pallas_src>

<mosaic_0001>
module attributes {stable_mosaic.version = 11 : i64} {
  func.func @_covpool_kernel(%arg0: i32, %arg1: i32, %arg2: memref<2x8x256xf32, #tpu.memory_space<vmem>>, %arg3: memref<2x8x8xf32, #tpu.memory_space<vmem>>, %arg4: memref<2x8x8xf32, #tpu.memory_space<vmem>>, %arg5: memref<2x8xf32, #tpu.memory_space<vmem>>) attributes {dimension_semantics = [#tpu.dimension_semantics<parallel>, #tpu.dimension_semantics<arbitrary>], iteration_bounds = array<i64: 1, 1>, scalar_prefetch = 0 : i64, scratch_operands = 2 : i64, tpu.core_type = #tpu.core_type<tc>, window_params = [{transform_indices = @transform_0, window_bounds = array<i64: 2, 8, 256>}, {transform_indices = @transform_1, window_bounds = array<i64: 2, 8, 8>}]} {
    %c0_i32 = arith.constant 0 : i32
    %0 = arith.cmpi eq, %arg1, %c0_i32 : i32
    %1 = arith.extui %0 : i1 to i32
    %c0_i32_0 = arith.constant 0 : i32
    %2 = arith.cmpi ne, %1, %c0_i32_0 : i32
    scf.if %2 {
      %cst_16 = arith.constant 0.000000e+00 : f32
      %15 = vector.broadcast %cst_16 : f32 to vector<2x8x8xf32>
      %c0_17 = arith.constant 0 : index
      %c0_18 = arith.constant 0 : index
      %c0_19 = arith.constant 0 : index
      %16 = vector.load %arg4[%c0_17, %c0_18, %c0_19] : memref<2x8x8xf32, #tpu.memory_space<vmem>>, vector<2x8x8xf32>
      tpu.vector_store %arg4[%c0_17, %c0_18, %c0_19], %15 {strides = array<i32>} : memref<2x8x8xf32, #tpu.memory_space<vmem>>, vector<2x8x8xf32>,
      %cst_20 = arith.constant 0.000000e+00 : f32
      %17 = vector.broadcast %cst_20 : f32 to vector<2x8xf32>
      %c0_21 = arith.constant 0 : index
      %c0_22 = arith.constant 0 : index
      %18 = vector.load %arg5[%c0_21, %c0_22] : memref<2x8xf32, #tpu.memory_space<vmem>>, vector<2x8xf32>
      tpu.vector_store %arg5[%c0_21, %c0_22], %17 {strides = array<i32>} : memref<2x8xf32, #tpu.memory_space<vmem>>, vector<2x8xf32>,
    } else {
    }
    %c0 = arith.constant 0 : index
    %c0_1 = arith.constant 0 : index
    %c0_2 = arith.constant 0 : index
    %3 = vector.load %arg2[%c0, %c0_1, %c0_2] : memref<2x8x256xf32, #tpu.memory_space<vmem>>, vector<2x8x256xf32>
    %c0_3 = arith.constant 0 : index
    %c0_4 = arith.constant 0 : index
    %c0_5 = arith.constant 0 : index
    %4 = vector.load %arg4[%c0_3, %c0_4, %c0_5] : memref<2x8x8xf32, #tpu.memory_space<vmem>>, vector<2x8x8xf32>
    %cst = arith.constant dense<0.000000e+00> : vector<2x8x8xf32>
    %5 = tpu.matmul %3, %3, %cst {dimension_numbers = #tpu.dot_dimension_numbers<[2], [2], [1], [1], [0, 0, 0, 1, 1, 1], [0], [0]>, precision = #tpu.contract_precision<fp32>} : vector<2x8x256xf32>, vector<2x8x256xf32>, vector<2x8x8xf32> -> vector<2x8x8xf32>
    %6 = arith.addf %4, %5 : vector<2x8x8xf32>
    %c0_6 = arith.constant 0 : index
    %c0_7 = arith.constant 0 : index
    %c0_8 = arith.constant 0 : index
    %7 = vector.load %arg4[%c0_6, %c0_7, %c0_8] : memref<2x8x8xf32, #tpu.memory_space<vmem>>, vector<2x8x8xf32>
    tpu.vector_store %arg4[%c0_6, %c0_7, %c0_8], %6 {strides = array<i32>} : memref<2x8x8xf32, #tpu.memory_space<vmem>>, vector<2x8x8xf32>,
    %c0_9 = arith.constant 0 : index
    %c0_10 = arith.constant 0 : index
    %8 = vector.load %arg5[%c0_9, %c0_10] : memref<2x8xf32, #tpu.memory_space<vmem>>, vector<2x8xf32>
    %cst_11 = arith.constant dense<0.000000e+00> : vector<2x8xf32>
    %9 = vector.multi_reduction <add>, %3, %cst_11 [2] : vector<2x8x256xf32> to vector<2x8xf32>
    %10 = arith.addf %8, %9 : vector<2x8xf32>
    %c0_12 = arith.constant 0 : index
    %c0_13 = arith.constant 0 : index
    %11 = vector.load %arg5[%c0_12, %c0_13] : memref<2x8xf32, #tpu.memory_space<vmem>>, vector<2x8xf32>
    tpu.vector_store %arg5[%c0_12, %c0_13], %10 {strides = array<i32>} : memref<2x8xf32, #tpu.memory_space<vmem>>, vector<2x8xf32>,
    %c0_i32_14 = arith.constant 0 : i32
    %12 = arith.cmpi eq, %arg1, %c0_i32_14 : i32
    %13 = arith.extui %12 : i1 to i32
    %c0_i32_15 = arith.constant 0 : i32
    %14 = arith.cmpi ne, %13, %c0_i32_15 : i32
    scf.if %14 {
      %c0_16 = arith.constant 0 : index
      %c0_17 = arith.constant 0 : index
      %15 = vector.load %arg5[%c0_16, %c0_17] : memref<2x8xf32, #tpu.memory_space<vmem>>, vector<2x8xf32>
      %cst_18 = arith.constant 3.906250e-03 : f32
      %16 = vector.broadcast %cst_18 : f32 to vector<2x8xf32>
      %17 = arith.mulf %15, %16 : vector<2x8xf32>
      %c0_19 = arith.constant 0 : index
      %c0_20 = arith.constant 0 : index
      %c0_21 = arith.constant 0 : index
      %18 = vector.load %arg4[%c0_19, %c0_20, %c0_21] : memref<2x8x8xf32, #tpu.memory_space<vmem>>, vector<2x8x8xf32>
      %cst_22 = arith.constant 3.906250e-03 : f32
      %19 = vector.broadcast %cst_22 : f32 to vector<2x8x8xf32>
      %20 = arith.mulf %19, %18 : vector<2x8x8xf32>
      %21 = vector.shape_cast %17 : vector<2x8xf32> to vector<2x8x1xf32>
      %22 = vector.shape_cast %17 : vector<2x8xf32> to vector<2x1x8xf32>
      %23 = vector.broadcast %21 : vector<2x8x1xf32> to vector<2x8x8xf32>
      %24 = vector.broadcast %22 : vector<2x1x8xf32> to vector<2x8x8xf32>
      %25 = arith.mulf %23, %24 : vector<2x8x8xf32>
      %26 = arith.subf %20, %25 : vector<2x8x8xf32>
      %c0_23 = arith.constant 0 : index
      %c0_24 = arith.constant 0 : index
      %c0_25 = arith.constant 0 : index
      %27 = vector.load %arg3[%c0_23, %c0_24, %c0_25] : memref<2x8x8xf32, #tpu.memory_space<vmem>>, vector<2x8x8xf32>
      tpu.vector_store %arg3[%c0_23, %c0_24, %c0_25], %26 {strides = array<i32>} : memref<2x8x8xf32, #tpu.memory_space<vmem>>, vector<2x8x8xf32>,
    } else {
    }
    return
  }
  func.func @transform_0(%arg0: i32, %arg1: i32) -> (i32, i32, i32) {
    %c0_i32 = arith.constant 0 : i32
    %c0_i32_0 = arith.constant 0 : i32
    return %arg0, %c0_i32, %arg1 : i32, i32, i32
  }
  func.func @transform_1(%arg0: i32, %arg1: i32) -> (i32, i32, i32) {
    %c0_i32 = arith.constant 0 : i32
    %c0_i32_0 = arith.constant 0 : i32
    %c0_i32_1 = arith.constant 0 : i32
    return %arg0, %c0_i32, %c0_i32_0 : i32, i32, i32
  }
}

</mosaic_0001>

<bundles_post_ra>
// kernel: tpu_custom_call.1
= control target key start
LH: loop header
LB: loop body
LE: loop exit
PB: predicated region body
PF: predicated region fallthrough
CT: control target
= control target key end

     0   :  { %6 = vsyncpa [#allocation5], 0  ;;  %s1220_s0 = inlined_call_operand.hbm [shape: f32[2,8,256], index: 0, kind: input, shape index: {}]   ;;  %s1221_s1 = inlined_call_operand.hbm [shape: f32[2,8,8], index: 1, kind: output, shape index: {}]  }
   0x1   :  { %7 = vsyncpa [#allocation6], 0  ;;  %s1147_s6 = smov [#allocation4]   ;;  %s1099_s10 = scalar_lea.hbm %s1220_s0, 512 }
   0x2   :  { %s13_s7 = sshll.u32 %s1147_s6, 4  ;;  %p1100_p0 = scmp.ne.s32.totalorder %s1220_s0, %s1099_s10  ;;  %s14_s7 = int_to_ptr.vmem [resolvable:$true] %s13_s7 }
   0x3   :  { %p1103_p1 = scmp.lt.u32.totalorder %s1099_s10, %s1220_s0 }
   0x5   :  { %p1105_p2 = pnand %p1103_p1, %p1100_p0 }
   0x7   :  { %1108 = shalt.err (!%p1105_p2)
}
   0x8   :  { %s1109_s15 = scalar_lea.vmem %s14_s7, 512  ;;  %p1114_p4 = scmp.lt.s32.totalorder %s14_s7, %s14_s7 }
   0x9   :  { %p1110_p3 = scmp.ne.s32.totalorder %s14_s7, %s1109_s15  ;;  %p1115_p5 = scmp.lt.s32.totalorder %s1109_s15, %s1109_s15 }
   0xb   :  { %p1116_p6 = por %p1115_p5, %p1114_p4 }
   0xd   :  { %p1117_p7 = pnand %p1116_p6, %p1110_p3 }
   0xf   :  { %1120 = shalt.err (!%p1117_p7)
}
  0x10   :  { %s1148_s16 = smov 256   ;;  %s1149_s17 = smov 16  }
  0x11   :  { %19 = dma.hbm_to_vmem [thread:$0]  %s1220_s0, 512, %s14_s7, [#allocation5], %s1148_s16, %s1148_s16, %s1149_s17  }
  0x12   :  { %1143 = dma.done.wait [#allocation5], 512  }
  0x13   :  { %1144 = vsyncadd [#allocation5], 4294966784  ;;  %v32_v0 = vld [vmem:[#allocation4] sm:$0xff]  ;;  %v33_v1 = vld [vmem:[#allocation4 + $0x8] sm:$0xff]  ;;  %vm30_vm0 = vcmask 58368   ;;  %v1150_v24 = vmov 0.0   ;;  %v996_v27 = vlaneseq }
  0x14   :  { %v34_v2 = vld [vmem:[#allocation4 + $0x10] sm:$0xff]  ;;  %v38_v3 = vand.u32 4294901760, %v33_v1  ;;  %v988_v4 = vadd.f32 %v33_v1, %v32_v0  ;;  %v40_v5 = vand.u32 4294901760, %v32_v0  ;;  %v35_v6 = vld [vmem:[#allocation4 + $0x18] sm:$0xff]  ;;  %31 = vst.msk [vmem:[#allocation3] sm:$0x3] %vm30_vm0, %v1150_v24 }
  0x15   :  { %v1177_v7 = vand.u32 4294901760, %v35_v6  ;;  %v991_v10 = vadd.f32 %v35_v6, %v34_v2  ;;  %v1179_v11 = vand.u32 4294901760, %v34_v2  ;;  %vm27_vm1 = vcmask 64512   ;;  %s1152_s0 = smov [#allocation7]  }
  0x16   :  { %v105_v8 = vsub.f32 %v33_v1, %v38_v3  ;;  %989 = vadd.xlane.f32.xlu0 %v988_v4  ;;  %v111_v9 = vsub.f32 %v32_v0, %v40_v5  ;;  %39 = vmatprep.subr.mxu0 %v38_v3  ;;  %28 = vst.msk [vmem:[#allocation2] sm:$0xff] %vm27_vm1, %v1150_v24  ;;  %29 = vst.msk [vmem:[#allocation2 + $0x8] sm:$0xff] %vm27_vm1, %v1150_v24  ;;  %v997_v28 = vand.u32 127, %v996_v27  ;;  %vm1006_vm2 = vcmask 1041409   ;;  %s1079_s20 = sshll.u32 %s1152_s0, 4  ;;  %s1080_s20 = int_to_ptr.vmem [resolvable:$true] %s1079_s20 }
  0x17   :  { %41 = vmatpush1.xpose.msra.mxu0 %v40_v5  ;;  %195 = vmatprep.mubr.f32.mxu1 %v38_v3  ;;  %v577_v14 = vsub.f32 %v35_v6, %v1177_v7  ;;  %v583_v17 = vsub.f32 %v34_v2, %v1179_v11  ;;  %v999_v29 = vshrl.u32 %v996_v27, 7  ;;  %v1151_v38 = vmov 1966171168   ;;  %s1121_s21 = scalar_lea.vmem %s1080_s20, 256  ;;  %p1126_p9 = scmp.lt.s32.totalorder %s1080_s20, %s1080_s20 }
  0x18   :  { %v106_v12 = vand.u32 4294901760, %v105_v8  ;;  %v112_v13 = vand.u32 4294901760, %v111_v9  ;;  %204 = vmatprep.subr.mxu0 %v105_v8  ;;  %v1037_v39 = vunpack.c.l.s4 %v1151_v38  ;;  %p1122_p8 = scmp.ne.s32.totalorder %s1080_s20, %s1121_s21  ;;  %p1127_p10 = scmp.lt.s32.totalorder %s1121_s21, %s1121_s21 }
  0x19   :  { %v578_v20 = vand.u32 4294901760, %v577_v14  ;;  %v584_v21 = vand.u32 4294901760, %v583_v17  ;;  %v1000_v31 = vsub.s32 %v997_v28, %v999_v29  ;;  %v1199_v41 = vsub.s32 0, %v999_v29 }
  0x1a   :  { %992 = vadd.xlane.f32.xlu0 %v991_v10  ;;  %v107_v15 = vsub.f32 %v105_v8, %v106_v12  ;;  %v113_v16 = vsub.f32 %v111_v9, %v112_v13  ;;  %v1038_v40 = vunpack.c.0.s8 %v1037_v39  ;;  %v1030_v46 = vsub.s32 1, %v999_v29  ;;  %p1128_p11 = por %p1127_p10, %p1126_p9 }
  0x1b   :  { %v579_v22 = vsub.f32 %v577_v14, %v578_v20  ;;  %v585_v23 = vsub.f32 %v583_v17, %v584_v21  ;;  %v987_v34 = vld [vmem:[#allocation3] sm:$0x3] }
  0x1c   :  { %v108_v18 = vand.u32 4294901760, %v107_v15  ;;  %v114_v19 = vand.u32 4294901760, %v113_v16  ;;  %v1041_v42 = vsub.s32 %v1038_v40, %v999_v29  ;;  %p1129_p12 = pnand %p1128_p11, %p1122_p8 }
  0x1d   :  { %v580_v25 = vand.u32 4294901760, %v579_v22  ;;  %v586_v26 = vand.u32 4294901760, %v585_v23  ;;  %v36_v4 = vld [vmem:[#allocation2] sm:$0xff]  ;;  %v37_v23 = vld [vmem:[#allocation2 + $0x8] sm:$0xff] }
  0x1e   :  { %125 = vmatprep.subr.mxu1 %v108_v18  ;;  %109 = vmatprep.mubr.f32.mxu0 %v108_v18 }
  0x1f   :  { %131 = vmatpush1.xpose.msra.mxu1 %v114_v19  ;;  %115 = vmatmul.mubr.f32.vlgmr.msra.gmra.mrb[0].mxu0 %v114_v19 }
  0x20   :  { %207 = vmatpush1.xpose.msra.mxu0 %v111_v9  ;;  %281 = vmatprep.subr.mxu1 %v38_v3 }
  0x21   :  { %272 = vmatprep.mubr.f32.mxu0 %v105_v8  ;;  %361 = vmatprep.subr.mxu0 %v106_v12 }
  0x22   :  { %197 = vmatmul.mubr.f32.vlgmr.msra.gmra.mrb[0].mxu1 %v40_v5 }
  0x23   :  { %283 = vmatpush1.xpose.msra.mxu1 %v40_v5  ;;  %275 = vmatmul.mubr.f32.vlgmr.msra.gmra.mrb[2].mxu0 %v111_v9 }
  0x24   :  { %349 = vmatprep.mubr.f32.mxu1 %v106_v12  ;;  %365 = vmatpush1.xpose.msra.mxu0 %v112_v13 }
  0x25   :  { %437 = vmatprep.subr.mxu1 %v38_v3  ;;  %429 = vmatprep.mubr.f32.mxu0 %v38_v3 }
  0x26   :  { %353 = vmatmul.mubr.f32.vlgmr.msra.gmra.mrb[2].mxu1 %v112_v13  ;;  %511 = vmatprep.subr.mxu0 %v1177_v7 }
  0x27   :  { %439 = vmatpush1.xpose.msra.mxu1 %v40_v5  ;;  %431 = vmatmul.mubr.f32.vlgmr.msra.gmra.mrb[4].mxu0 %v40_v5 }
  0x28   :  { %503 = vmatprep.mubr.f32.mxu1 %v38_v3  ;;  %513 = vmatpush1.xpose.msra.mxu0 %v1179_v11 }
  0x29   :  { %597 = vmatprep.subr.mxu1 %v580_v25  ;;  %581 = vmatprep.mubr.f32.mxu0 %v580_v25 }
  0x2a   :  { %505 = vmatmul.mubr.f32.vlgmr.msra.gmra.mrb[4].mxu1 %v40_v5  ;;  %676 = vmatprep.subr.mxu0 %v577_v14 }
  0x2b   :  { %603 = vmatpush1.xpose.msra.mxu1 %v586_v26  ;;  %587 = vmatmul.mubr.f32.vlgmr.msra.gmra.mrb[6].mxu0 %v586_v26 }
  0x2c   :  { %667 = vmatprep.mubr.f32.mxu1 %v1177_v7  ;;  %679 = vmatpush1.xpose.msra.mxu0 %v583_v17 }
  0x2d   :  { %753 = vmatprep.subr.mxu1 %v1177_v7  ;;  %744 = vmatprep.mubr.f32.mxu0 %v577_v14 }
  0x2e   :  { %669 = vmatmul.mubr.f32.vlgmr.msra.gmra.mrb[6].mxu1 %v1179_v11  ;;  %833 = vmatprep.subr.mxu0 %v578_v20 }
  0x2f   :  { %755 = vmatpush1.xpose.msra.mxu1 %v1179_v11  ;;  %747 = vmatmul.mubr.f32.vlgmr.msra.gmra.mrb[8].mxu0 %v583_v17 }
  0x30   :  { %821 = vmatprep.mubr.f32.mxu1 %v578_v20  ;;  %837 = vmatpush1.xpose.msra.mxu0 %v584_v21 }
  0x31   :  { %909 = vmatprep.subr.mxu1 %v1177_v7  ;;  %901 = vmatprep.mubr.f32.mxu0 %v1177_v7 }
  0x32   :  { %825 = vmatmul.mubr.f32.vlgmr.msra.gmra.mrb[8].mxu1 %v584_v21 }
  0x33   :  { %911 = vmatpush1.xpose.msra.mxu1 %v1179_v11  ;;  %903 = vmatmul.mubr.f32.vlgmr.msra.gmra.mrb[10].mxu0 %v1179_v11 }
  0x34   :  { %975 = vmatprep.mubr.f32.mxu1 %v1177_v7 }
  0x36   :  { %977 = vmatmul.mubr.f32.vlgmr.msra.gmra.mrb[10].mxu1 %v1179_v11 }
  0xa3   :  { %v990_v30 = vpop.xlane.xlu0 %989 }
  0xa4   :  { %v1001_v33 = vrot.slane %v990_v30, %v1000_v31 }
  0xa7   :  { %v993_v32 = vpop.xlane.xlu0 %992 }
  0xa8   :  { %v1005_v35 = vrot.slane %v993_v32, %v1000_v31 }
  0xaa   :  { %v1007_v36 = vsel %vm1006_vm2, %v1005_v35, %v1001_v33 }
  0xab   :  { %v1009_v37 = vadd.f32 %v1007_v36, %v987_v34 }
  0xad   :  { %1011 = vst.msk [vmem:[#allocation3] sm:$0x3] %vm30_vm0, %v1009_v37 }
  0xb4   :  { %v1015_v43 = vld [vmem:[#allocation3] sm:$0x3] }
  0xb5   :  { %v1016_v44 = vmul.f32 0.00390625, %v1015_v43 }
  0xb7   :  { %v1024_v45 = vrot.slane %v1016_v44, %v1199_v41  ;;  %v1042_v47 = vrot.slane %v1016_v44, %v1041_v42  ;;  %v1031_v50 = vrot.slane %v1016_v44, %v1030_v46 }
  0xb9   :  { %1026 = vbcast.lane.b32.xlu1 %v1024_v45, 256  ;;  %v1050_v48 = vrot.slane %v1042_v47, %v1041_v42  ;;  %v1043_v49 = vcombine.high %v1042_v47, %v1042_v47 }
  0xbb   :  { %v1061_v51 = vrot.slane %v1050_v48, %v1199_v41  ;;  %v1057_v52 = vrot.slane %v1043_v49, %v1041_v42 }
  0xbd   :  { %1033 = vbcast.lane.b32.xlu1 %v1031_v50, 256  ;;  %v1065_v53 = vrot.slane %v1057_v52, %v1199_v41 }
  0xf2   :  { %v116_v54 = vpop.f32.mrb[0].mxu0 }
  0xf3   :  { %v118_v55 = vpop.f32.mrb[1].mxu0 }
  0xf5   :  { %v198_v56 = vpop.f32.mrb[0].mxu1 }
  0xf6   :  { %v199_v57 = vadd.f32 %v198_v56, %v116_v54  ;;  %v200_v58 = vpop.f32.mrb[1].mxu1  ;;  %v276_v59 = vpop.f32.mrb[2].mxu0 }
  0xf7   :  { %v278_v60 = vpop.f32.mrb[3].mxu0 }
  0xf8   :  { %v277_v61 = vadd.f32 %v276_v59, %v199_v57 }
  0xf9   :  { %v354_v62 = vpop.f32.mrb[2].mxu1 }
  0xfa   :  { %v355_v63 = vadd.f32 %v354_v62, %v277_v61  ;;  %v356_v0 = vpop.f32.mrb[3].mxu1  ;;  %v432_v1 = vpop.f32.mrb[4].mxu0 }
  0xfb   :  { %v434_v2 = vpop.f32.mrb[5].mxu0 }
  0xfc   :  { %v433_v3 = vadd.f32 %v432_v1, %v355_v63 }
  0xfd   :  { %v506_v5 = vpop.f32.mrb[4].mxu1 }
  0xfe   :  { %v507_v6 = vadd.f32 %v506_v5, %v433_v3  ;;  %v508_v7 = vpop.f32.mrb[5].mxu1  ;;  %v588_v8 = vpop.f32.mrb[6].mxu0 }
  0xff   :  { %v590_v9 = vpop.f32.mrb[7].mxu0 }
 0x100   :  { %v982_v10 = vadd.f32 %v507_v6, %v36_v4 }
 0x101   :  { %v670_v11 = vpop.f32.mrb[6].mxu1 }
 0x102   :  { %985 = vst.msk [vmem:[#allocation2] sm:$0xff] %vm27_vm1, %v982_v10  ;;  %v671_v12 = vadd.f32 %v670_v11, %v588_v8  ;;  %v672_v13 = vpop.f32.mrb[7].mxu1  ;;  %v748_v14 = vpop.f32.mrb[8].mxu0 }
 0x103   :  { %v750_v15 = vpop.f32.mrb[9].mxu0 }
 0x104   :  { %v749_v16 = vadd.f32 %v748_v14, %v671_v12 }
 0x105   :  { %v826_v17 = vpop.f32.mrb[8].mxu1 }
 0x106   :  { %v827_v18 = vadd.f32 %v826_v17, %v749_v16  ;;  %v828_v19 = vpop.f32.mrb[9].mxu1  ;;  %v904_v20 = vpop.f32.mrb[10].mxu0 }
 0x107   :  { %v906_v21 = vpop.f32.mrb[11].mxu0 }
 0x108   :  { %v905_v22 = vadd.f32 %v904_v20, %v827_v18 }
 0x109   :  { %v978_v24 = vpop.f32.mrb[10].mxu1  ;;  %v1017_v28 = vld [vmem:[#allocation2] sm:$0xff] }
 0x10a   :  { %v979_v25 = vadd.f32 %v978_v24, %v905_v22  ;;  %v980_v26 = vpop.f32.mrb[11].mxu1  ;;  %v1019_v30 = vmul.f32 0.00390625, %v1017_v28 }
 0x10c   :  { %v983_v27 = vadd.f32 %v979_v25, %v37_v23 }
 0x10e   :  { %986 = vst.msk [vmem:[#allocation2 + $0x8] sm:$0xff] %vm27_vm1, %v983_v27 }
 0x115   :  { %v1018_v32 = vld [vmem:[#allocation2 + $0x8] sm:$0xff] }
 0x116   :  { %v1020_v35 = vmul.f32 0.00390625, %v1018_v32 }
 0x12b   :  { %v1027_v29 = vpop.permute.xlu1 %1026 }
 0x12c   :  { %v1068_v31 = vmul.f32 %v1061_v51, %v1027_v29 }
 0x12e   :  { %v1070_v33 = vsub.f32 %v1019_v30, %v1068_v31 }
 0x12f   :  { %v1034_v34 = vpop.permute.xlu1 %1033 }
 0x130   :  { %1072 = vst.msk [vmem:[#allocation7] sm:$0xff] %vm27_vm1, %v1070_v33  ;;  %v1069_v36 = vmul.f32 %v1065_v53, %v1034_v34 }
 0x132   :  { %v1071_v37 = vsub.f32 %v1020_v35, %v1069_v36 }
 0x134   :  { %1073 = vst.msk [vmem:[#allocation7 + $0x8] sm:$0xff] %vm27_vm1, %v1071_v37 }
 0x135   :  { %1132 = shalt.err (!%p1129_p12)
}
 0x136   :  { %s1133_s24 = scalar_lea.hbm %s1221_s1, 256 }
 0x137   :  { %p1134_p13 = scmp.ne.s32.totalorder %s1221_s1, %s1133_s24  ;;  %p1137_p0 = scmp.lt.u32.totalorder %s1133_s24, %s1221_s1 }
 0x139   :  { %p1139_p1 = pnand %p1137_p0, %p1134_p13 }
 0x13b   :  { %1142 = shalt.err (!%p1139_p1)
}
 0x13c   :  { %s1153_s29 = smov 128   ;;  %s1154_s30 = smov 8  }
 0x13d   :  { %1085 = dma.vmem_to_hbm [thread:$0]  %s1080_s20, 256, %s1221_s1, [#allocation6], %s1153_s29, %s1153_s29, %s1154_s30  }
 0x13e   :  { %1145 = dma.done.wait [#allocation6], 256  }
 0x13f   :  { %1146 = vsyncadd [#allocation6], 4294967040 }
 0x140   :  { %1089 = vsyncpa [#allocation5], 1 }
 0x141   :  { %1090 = vsyncpa [#allocation6], 1 }

</bundles_post_ra>
